<compile_context>
chip_gen: v7x
topology: tpu7x:2x2x1
jax: 0.10.0
libtpu: 0.0.40
codegen_flags: <defaults>
</compile_context>

<pallas_src>
import functools

import jax
import jax.numpy as jnp
from jax.experimental import pallas as pl
from jax.experimental.pallas import tpu as pltpu


# --------------------------------------------------------------------------
# Kernel
# --------------------------------------------------------------------------
def _importance_kernel(attn_ref, out_ref, *, inv_heads, total_cols, col_tile,
                       mask_cols):
    # attn_ref: (H, T_R, tc)  one batch, all heads, one column tile
    # out_ref : (T_R, 1) f32  resident across the column-tile axis
    c = pl.program_id(1)
    n_c = pl.num_programs(1)

    # Head mean in f32 (VPU adds over the folded head axis).
    p = jnp.sum(attn_ref[...].astype(jnp.float32), axis=0) * jnp.float32(inv_heads)

    # Entropy contribution of this column tile.  Guard 0*log(0) -> 0
    # (the torch reference would yield NaN for exact zeros).
    plogp = jnp.where(p > 0.0, p * jnp.log(p), jnp.float32(0.0))
    if mask_cols:
        # Partial last tile: zero out the out-of-range (padded) columns.
        col = c * col_tile + jax.lax.broadcasted_iota(jnp.int32, p.shape, 1)
        plogp = jnp.where(col < total_cols, plogp, jnp.float32(0.0))
    contrib = jnp.sum(plogp, axis=1, keepdims=True)          # (T_R, 1)

    @pl.when(c == 0)
    def _init():
        out_ref[...] = contrib

    @pl.when(c != 0)
    def _accumulate():
        out_ref[...] = out_ref[...] + contrib

    # Last column tile: T_R-wise normalisation + masked zeroing.
    # (Lane-sparse (T_R,1) reductions -- negligible for these T_R; for very
    #  long contexts this finalize should move out of the kernel.)
    @pl.when(c == n_c - 1)
    def _finalize():
        ent = out_ref[...]
        s = ent - jnp.min(ent, axis=0, keepdims=True)
        s = s / jnp.max(s, axis=0, keepdims=True)
        mean = jnp.mean(s, axis=0, keepdims=True)
        mask = s < mean
        s = s - mean
        s = s / jnp.max(s, axis=0, keepdims=True)
        out_ref[...] = jnp.where(mask, jnp.float32(0.0), s)


# --------------------------------------------------------------------------
# Tiling / VMEM helpers (generation-aware)
# --------------------------------------------------------------------------
def _vmem_budget_bytes() -> int:
    """Usable VMEM budget for this chip generation."""
    cap = None
    try:
        cap = getattr(pltpu.get_tpu_info(), "vmem_capacity_bytes", None)
    except Exception:
        cap = None
    if cap is None:
        return 44 << 20            # conservative: safe on every generation
    if cap <= (64 << 20):          # v7x: 64 MiB physical, leave Mosaic headroom
        return 44 << 20
    return 96 << 20                # v5e / v6e: 128 MiB physical


def _out_block_bytes(t_r: int) -> int:
    # (T_R, 1) f32 output block pads to 128 lanes in VMEM; assume 2 buffers.
    return 2 * t_r * 128 * 4


def _pick_col_tile(h: int, t_r: int, t_c: int, itemsize: int, budget: int) -> int:
    """Column tile: prefer the full T_C, else the largest fitting 128-multiple."""
    def fits(tc):
        return 2 * h * t_r * tc * itemsize + _out_block_bytes(t_r) <= budget

    if fits(t_c):
        return t_c                                   # one contiguous DMA per step

    best_fit = None                                  # largest fitting 128-multiple
    best_div = None                                  # ... that also divides T_C
    for tc in range((t_c // 128) * 128, 0, -128):
        if not fits(tc):
            continue
        if best_fit is None:
            best_fit = tc
        if t_c % tc == 0:
            best_div = tc
            break
    if best_div is not None and best_fit is not None and best_div * 2 >= best_fit:
        return best_div                              # even tiles, no masking needed
    if best_fit is not None:
        return best_fit                              # masked partial last tile
    # TODO(synk): H*T_R too large even for tc=128 -> would need T_R tiling.
    return 128


# --------------------------------------------------------------------------
# Wrapper
# --------------------------------------------------------------------------
def tldr_importance(attn_weights: jax.Array, *, col_tile: int | None = None) -> jax.Array:
    """attn_weights: (B, H, T_R, T_C) [f32 or bf16] -> scores: (B, T_R, 1) f32."""
    B, H, T_R, T_C = attn_weights.shape
    itemsize = jnp.dtype(attn_weights.dtype).itemsize
    budget = _vmem_budget_bytes()

    if col_tile is None:
        tc = _pick_col_tile(H, T_R, T_C, itemsize, budget)
    else:
        if col_tile != T_C and col_tile % 128 != 0:
            raise ValueError("col_tile must be a multiple of 128 or equal to T_C")
        tc = col_tile

    n_c = pl.cdiv(T_C, tc)
    mask_cols = (T_C % tc) != 0

    # Scoped-VMEM limit sized to the chosen tiles (double-buffered input block
    # plus the padded resident output block), with headroom, generation-capped.
    needed = 2 * H * T_R * tc * itemsize + _out_block_bytes(T_R)
    vmem_limit = int(max(16 << 20, min(budget, needed + (4 << 20))))
    vmem_limit = int(max(vmem_limit, needed + (2 << 20)))

    kernel = functools.partial(
        _importance_kernel,
        inv_heads=1.0 / H,
        total_cols=T_C,
        col_tile=tc,
        mask_cols=mask_cols,
    )

    return pl.pallas_call(
        kernel,
        out_shape=jax.ShapeDtypeStruct((B, T_R, 1), jnp.float32),
        grid_spec=pltpu.PrefetchScalarGridSpec(
            num_scalar_prefetch=0,
            grid=(B, n_c),                       # B parallel; column tiles reduce
            in_specs=[
                # One batch, ALL heads, one column tile per step (batch squeezed).
                pl.BlockSpec((None, H, T_R, tc), lambda b, c: (b, 0, 0, c)),
            ],
            out_specs=pl.BlockSpec((None, T_R, 1), lambda b, c: (b, 0, 0)),
        ),
        compiler_params=pltpu.CompilerParams(
            dimension_semantics=("parallel", "arbitrary"),
            vmem_limit_bytes=vmem_limit,
        ),
    )(attn_weights)


# --------------------------------------------------------------------------
# Pure-JAX reference (mirror of the torch forward) for verification
# --------------------------------------------------------------------------
def _reference(attn_weights: jax.Array) -> jax.Array:
    score_attn = attn_weights.mean(axis=1)                               # (B,T_R,T_C)
    scores = (score_attn * jnp.log(score_attn)).sum(axis=2)[..., None]   # (B,T_R,1)
    scores = scores - scores.min(axis=1, keepdims=True)
    scores = scores / scores.max(axis=1, keepdims=True)
    mean = scores.mean(axis=1, keepdims=True)
    mask = scores < mean
    scores = scores - mean
    scores = scores / scores.max(axis=1, keepdims=True)
    return jnp.where(mask, 0.0, scores)


if __name__ == "__main__":
    key = jax.random.PRNGKey(0)
    k1, k2, k3 = jax.random.split(key, 3)

    # --- Test 1: f32, tc == T_C (single column tile, heads folded into block).
    B, H, T_R, T_C = 2, 4, 8, 384
    attn = jax.nn.softmax(
        jax.random.normal(k1, (B, H, T_R, T_C), dtype=jnp.float32), axis=-1)
    out = jax.block_until_ready(tldr_importance(attn))
    ref = _reference(attn)
    assert out.shape == (B, T_R, 1)
    assert bool(jnp.allclose(out, ref, atol=1e-4, rtol=1e-4)), (
        "test1 max abs diff = %f" % float(jnp.max(jnp.abs(out - ref))))

    # --- Test 2: bf16 input (half the HBM traffic), f32 accumulation in-kernel.
    B2, H2, T_R2, T_C2 = 2, 8, 128, 512
    attn_bf16 = jax.nn.softmax(
        jax.random.normal(k2, (B2, H2, T_R2, T_C2), dtype=jnp.float32),
        axis=-1).astype(jnp.bfloat16)
    out2 = jax.block_until_ready(tldr_importance(attn_bf16))
    ref2 = _reference(attn_bf16.astype(jnp.float32))
    assert out2.shape == (B2, T_R2, 1)
    assert bool(jnp.all(jnp.isfinite(out2)))
    assert bool(jnp.allclose(out2, ref2, atol=5e-3)), (
        "test2 max abs diff = %f" % float(jnp.max(jnp.abs(out2 - ref2))))

    # --- Test 3: forced column tiling with a masked partial last tile
    #             (T_C = 320 with tc = 128 -> 3 tiles, last one half empty).
    B3, H3, T_R3, T_C3 = 2, 4, 16, 320
    attn3 = jax.nn.softmax(
        jax.random.normal(k3, (B3, H3, T_R3, T_C3), dtype=jnp.float32), axis=-1)
    out3 = jax.block_until_ready(tldr_importance(attn3, col_tile=128))
    ref3 = _reference(attn3)
    assert out3.shape == (B3, T_R3, 1)
    assert bool(jnp.allclose(out3, ref3, atol=1e-4, rtol=1e-4)), (
        "test3 max abs diff = %f" % float(jnp.max(jnp.abs(out3 - ref3))))

    print("KERNEL_OK")
</pallas_src>

<mosaic_0001>
module attributes {stable_mosaic.version = 11 : i64} {
  func.func @_importance_kernel(%arg0: i32, %arg1: i32, %arg2: memref<1x4x8x384xf32, #tpu.memory_space<vmem>>, %arg3: memref<1x8x1xf32, #tpu.memory_space<vmem>>) attributes {dimension_semantics = [#tpu.dimension_semantics<parallel>, #tpu.dimension_semantics<arbitrary>], iteration_bounds = array<i64: 2, 1>, scalar_prefetch = 0 : i64, scratch_operands = 0 : i64, tpu.core_type = #tpu.core_type<tc>, window_params = [{transform_indices = @transform_0, window_bounds = array<i64: 1, 4, 8, 384>}, {transform_indices = @transform_1, window_bounds = array<i64: 1, 8, 1>}]} {
    %c0 = arith.constant 0 : index
    %c0_0 = arith.constant 0 : index
    %c0_1 = arith.constant 0 : index
    %c0_2 = arith.constant 0 : index
    %0 = vector.load %arg2[%c0, %c0_0, %c0_1, %c0_2] : memref<1x4x8x384xf32, #tpu.memory_space<vmem>>, vector<1x4x8x384xf32>
    %1 = vector.shape_cast %0 : vector<1x4x8x384xf32> to vector<4x8x384xf32>
    %cst = arith.constant dense<0.000000e+00> : vector<8x384xf32>
    %2 = vector.multi_reduction <add>, %1, %cst [0] : vector<4x8x384xf32> to vector<8x384xf32>
    %cst_3 = arith.constant 2.500000e-01 : f32
    %3 = vector.broadcast %cst_3 : f32 to vector<8x384xf32>
    %4 = arith.mulf %2, %3 : vector<8x384xf32>
    %cst_4 = arith.constant 0.000000e+00 : f32
    %5 = vector.broadcast %cst_4 : f32 to vector<8x384xf32>
    %6 = arith.cmpf ogt, %4, %5 : vector<8x384xf32>
    %7 = math.log %4 : vector<8x384xf32>
    %8 = arith.mulf %4, %7 : vector<8x384xf32>
    %cst_5 = arith.constant 0.000000e+00 : f32
    %9 = vector.broadcast %cst_5 : f32 to vector<8x384xf32>
    %10 = arith.select %6, %8, %9 : vector<8x384xi1>, vector<8x384xf32>
    %cst_6 = arith.constant dense<0.000000e+00> : vector<8xf32>
    %11 = vector.multi_reduction <add>, %10, %cst_6 [1] : vector<8x384xf32> to vector<8xf32>
    %12 = vector.shape_cast %11 : vector<8xf32> to vector<8x1xf32>
    %c0_i32 = arith.constant 0 : i32
    %13 = arith.cmpi eq, %arg1, %c0_i32 : i32
    %14 = arith.extui %13 : i1 to i32
    %c0_i32_7 = arith.constant 0 : i32
    %15 = arith.cmpi ne, %14, %c0_i32_7 : i32
    scf.if %15 {
      %c0_12 = arith.constant 0 : index
      %c0_13 = arith.constant 0 : index
      %c0_14 = arith.constant 0 : index
      %22 = vector.load %arg3[%c0_12, %c0_13, %c0_14] : memref<1x8x1xf32, #tpu.memory_space<vmem>>, vector<1x8x1xf32>
      %23 = vector.shape_cast %22 : vector<1x8x1xf32> to vector<8x1xf32>
      %24 = vector.shape_cast %12 : vector<8x1xf32> to vector<1x8x1xf32>
      tpu.vector_store %arg3[%c0_12, %c0_13, %c0_14], %24 {strides = array<i32>} : memref<1x8x1xf32, #tpu.memory_space<vmem>>, vector<1x8x1xf32>,
    } else {
    }
    %c0_i32_8 = arith.constant 0 : i32
    %16 = arith.cmpi ne, %arg1, %c0_i32_8 : i32
    %17 = arith.extui %16 : i1 to i32
    %c0_i32_9 = arith.constant 0 : i32
    %18 = arith.cmpi ne, %17, %c0_i32_9 : i32
    scf.if %18 {
      %c0_12 = arith.constant 0 : index
      %c0_13 = arith.constant 0 : index
      %c0_14 = arith.constant 0 : index
      %22 = vector.load %arg3[%c0_12, %c0_13, %c0_14] : memref<1x8x1xf32, #tpu.memory_space<vmem>>, vector<1x8x1xf32>
      %23 = vector.shape_cast %22 : vector<1x8x1xf32> to vector<8x1xf32>
      %24 = arith.addf %23, %12 : vector<8x1xf32>
      %c0_15 = arith.constant 0 : index
      %c0_16 = arith.constant 0 : index
      %c0_17 = arith.constant 0 : index
      %25 = vector.load %arg3[%c0_15, %c0_16, %c0_17] : memref<1x8x1xf32, #tpu.memory_space<vmem>>, vector<1x8x1xf32>
      %26 = vector.shape_cast %25 : vector<1x8x1xf32> to vector<8x1xf32>
      %27 = vector.shape_cast %24 : vector<8x1xf32> to vector<1x8x1xf32>
      tpu.vector_store %arg3[%c0_15, %c0_16, %c0_17], %27 {strides = array<i32>} : memref<1x8x1xf32, #tpu.memory_space<vmem>>, vector<1x8x1xf32>,
    } else {
    }
    %c0_i32_10 = arith.constant 0 : i32
    %19 = arith.cmpi eq, %arg1, %c0_i32_10 : i32
    %20 = arith.extui %19 : i1 to i32
    %c0_i32_11 = arith.constant 0 : i32
    %21 = arith.cmpi ne, %20, %c0_i32_11 : i32
    scf.if %21 {
      %c0_12 = arith.constant 0 : index
      %c0_13 = arith.constant 0 : index
      %c0_14 = arith.constant 0 : index
      %22 = vector.load %arg3[%c0_12, %c0_13, %c0_14] : memref<1x8x1xf32, #tpu.memory_space<vmem>>, vector<1x8x1xf32>
      %23 = vector.shape_cast %22 : vector<1x8x1xf32> to vector<8x1xf32>
      %cst_15 = arith.constant dense<0x7F800000> : vector<1xf32>
      %24 = vector.multi_reduction <minimumf>, %23, %cst_15 [0] : vector<8x1xf32> to vector<1xf32>
      %25 = vector.shape_cast %24 : vector<1xf32> to vector<1x1xf32>
      %26 = vector.broadcast %25 : vector<1x1xf32> to vector<8x1xf32>
      %27 = arith.subf %23, %26 : vector<8x1xf32>
      %cst_16 = arith.constant dense<0xFF800000> : vector<1xf32>
      %28 = vector.multi_reduction <maximumf>, %27, %cst_16 [0] : vector<8x1xf32> to vector<1xf32>
      %29 = vector.shape_cast %28 : vector<1xf32> to vector<1x1xf32>
      %30 = vector.broadcast %29 : vector<1x1xf32> to vector<8x1xf32>
      %31 = arith.divf %27, %30 : vector<8x1xf32>
      %cst_17 = arith.constant dense<0.000000e+00> : vector<1xf32>
      %32 = vector.multi_reduction <add>, %31, %cst_17 [0] : vector<8x1xf32> to vector<1xf32>
      %33 = vector.shape_cast %32 : vector<1xf32> to vector<1x1xf32>
      %cst_18 = arith.constant 8.000000e+00 : f32
      %34 = vector.broadcast %cst_18 : f32 to vector<1x1xf32>
      %35 = arith.divf %33, %34 : vector<1x1xf32>
      %36 = vector.broadcast %35 : vector<1x1xf32> to vector<8x1xf32>
      %37 = arith.cmpf olt, %31, %36 : vector<8x1xf32>
      %38 = vector.broadcast %35 : vector<1x1xf32> to vector<8x1xf32>
      %39 = arith.subf %31, %38 : vector<8x1xf32>
      %cst_19 = arith.constant dense<0xFF800000> : vector<1xf32>
      %40 = vector.multi_reduction <maximumf>, %39, %cst_19 [0] : vector<8x1xf32> to vector<1xf32>
      %41 = vector.shape_cast %40 : vector<1xf32> to vector<1x1xf32>
      %42 = vector.broadcast %41 : vector<1x1xf32> to vector<8x1xf32>
      %43 = arith.divf %39, %42 : vector<8x1xf32>
      %cst_20 = arith.constant 0.000000e+00 : f32
      %44 = vector.broadcast %cst_20 : f32 to vector<8x1xf32>
      %45 = arith.select %37, %44, %43 : vector<8x1xi1>, vector<8x1xf32>
      %c0_21 = arith.constant 0 : index
      %c0_22 = arith.constant 0 : index
      %c0_23 = arith.constant 0 : index
      %46 = vector.load %arg3[%c0_21, %c0_22, %c0_23] : memref<1x8x1xf32, #tpu.memory_space<vmem>>, vector<1x8x1xf32>
      %47 = vector.shape_cast %46 : vector<1x8x1xf32> to vector<8x1xf32>
      %48 = vector.shape_cast %45 : vector<8x1xf32> to vector<1x8x1xf32>
      tpu.vector_store %arg3[%c0_21, %c0_22, %c0_23], %48 {strides = array<i32>} : memref<1x8x1xf32, #tpu.memory_space<vmem>>, vector<1x8x1xf32>,
    } else {
    }
    return
  }
  func.func @transform_0(%arg0: i32, %arg1: i32) -> (i32, i32, i32, i32) {
    %c0_i32 = arith.constant 0 : i32
    %c0_i32_0 = arith.constant 0 : i32
    %c0_i32_1 = arith.constant 0 : i32
    return %arg0, %c0_i32, %c0_i32_0, %arg1 : i32, i32, i32, i32
  }
  func.func @transform_1(%arg0: i32, %arg1: i32) -> (i32, i32, i32) {
    %c0_i32 = arith.constant 0 : i32
    %c0_i32_0 = arith.constant 0 : i32
    %c0_i32_1 = arith.constant 0 : i32
    return %arg0, %c0_i32, %c0_i32_0 : i32, i32, i32
  }
}

</mosaic_0001>

<bundles_post_ra>
// kernel: tpu_custom_call.1
= control target key start
LH: loop header
LB: loop body
LE: loop exit
PB: predicated region body
PF: predicated region fallthrough
CT: control target
= control target key end

     0   :  { %6 = vsyncpa [#allocation3], 0  ;;  %s632_s0 = inlined_call_operand.hbm [shape: f32[2,4,8,384], index: 0, kind: input, shape index: {}]   ;;  %s633_s1 = inlined_call_operand.vmem [shape: f32[2,8,1], index: 1, kind: output, shape index: {}]  }
   0x1   :  { %8 = vsyncpa [#allocation3 + $0x1], 0  ;;  %s503_s6 = smov 0   ;;  %s505_s7 = smov 0  }
   0x2   :  { %s507_s8 = smov 0   ;;  %s509_s9 = smov 0  }
   0x3   :  { %s511_s10 = smov 0   ;;  %s513_s11 = smov 0  }
   0x4 LB: > { %s329_s12 = sadd.s32 4294967295, %s488_s11   ;;  %s26_s13 = sadd.s32 1, %s484_s10  ;;  %s488_s11 = sphi %s513_s11, %s14_s11   ;;  %s484_s10 = sphi %s511_s10, %s640_s10   ;;  %s480_s9 = sphi %s509_s9, %s639_s9   ;;  %s476_s8 = sphi %s507_s8, %s638_s8   ;;  %s472_s7 = sphi %s505_s7, %s637_s7   ;;  %s468_s6 = sphi %s503_s6, %s636_s6  }
   0x5   : > { %p28_p0 = scmp.ge.s32.totalorder %s26_s13, 2  ;;  %s35_s14 = sadd.s32 1, %s476_s8 }
   0x6   : > { %p42_p1 = scmp.ne.s32.totalorder %s476_s8, %s472_s7  ;;  %p43_p2 = scmp.eq.s32.totalorder %s488_s11, 0 }
   0x7   : > { %s642_s13 = smov (%p28_p0, %s26_s13), 0  ;;  %p48_p4 = scmp.ne.s32.totalorder %s472_s7, %s468_s6 }
   0x8   : > { %p44_p3 = por %p43_p2, %p42_p1  ;;  %s30_s15 = ssub.s32 %s484_s10, %s642_s13 }
   0x9   : > { %p49_p5 = scmp.eq.s32.totalorder %s329_s12, 0  ;;  %p33_p6 = scmp.eq.s32.totalorder %s30_s15, 0 }
   0xa   : > { %p347_p8 = scmp.lt.s32.totalorder %s488_s11, 2  ;;  %s98_s18 = sand.u32 1, %s476_s8  }
   0xb   : > { %p542_p7 = por %p49_p5, %p48_p4  ;;  %s339_s19 = smul.u32 1536, %s484_s10 }
   0xc   : > { %s548_s17 = scalar_select %p33_p6, %s476_s8, %s35_s14  }
   0xd   : > { %s338_s20 = smul.u32 96, %s98_s18  ;;  %s555_s23 = scalar_lea.hbm %s632_s0, %s339_s19 }
   0xe   : > { %p557_p9 = pnand %p347_p8, %p44_p3  ;;  %s563_s27 = scalar_lea.sflag [#allocation3], %s98_s18 }
   0xf   : > { %s102_s25 = scalar_lea.vmem [#allocation2], %s338_s20  ;;  %s408_s28 = scalar_lea.hbm %s555_s23, 1536 }
  0x10   : > { %s111_s26 = sshll.u32 %s102_s25, 4  ;;  %p409_p10 = scmp.ne.s32.totalorder %s555_s23, %s408_s28  ;;  %s561_s26 = int_to_ptr.vmem [resolvable:$true] %s111_s26 }
  0x11   : > { %p410_p11 = pneg %p557_p9  ;;  %s413_s2 = scalar_lea.hbm %s632_s0, 3072 }
  0x12   : > { %p414_p0 = scmp.lt.u32.totalorder %s555_s23, %s632_s0  ;;  %p415_p1 = scmp.lt.u32.totalorder %s413_s2, %s408_s28 }
  0x13   : > { %p411_p12 = pnand %p410_p11, %p409_p10  ;;  %p417_p3 = scmp.lt.u32.totalorder %s408_s28, %s555_s23 }
  0x14   : > { %p416_p2 = por %p415_p1, %p414_p0 }
  0x15   : > { %p412_p13 = pneg %p411_p12 }
  0x16   : > { %p418_p4 = por %p417_p3, %p416_p2 }
  0x18   : > { %p419_p5 = pnand %p418_p4, %p412_p13 }
  0x1a   : > { %422 = shalt.err (!%p419_p5)
}
  0x1b   : > { %s423_s5 = scalar_lea.vmem %s561_s26, 1536  ;;  %s490_s6 = smov [#allocation2]  }
  0x1c   : > { %p424_p6 = scmp.ne.s32.totalorder %s561_s26, %s423_s5  ;;  %s428_s12 = sshll.u32 %s490_s6, 4  ;;  %s429_s12 = int_to_ptr.vmem [resolvable:$false] %s428_s12 }
  0x1d   : > { %s430_s14 = scalar_lea.vmem %s429_s12, 3072  ;;  %p431_p12 = scmp.lt.s32.totalorder %s561_s26, %s429_s12 }
  0x1e   : > { %p426_p8 = pnand %p424_p6, %p410_p11  ;;  %p432_p0 = scmp.lt.s32.totalorder %s430_s14, %s423_s5 }
  0x20   : > { %p427_p10 = pneg %p426_p8  ;;  %p433_p1 = por %p432_p0, %p431_p12 }
  0x22   : > { %p434_p2 = pnand %p433_p1, %p427_p10 }
  0x24   : > { %437 = shalt.err (!%p434_p2)
}
  0x25   : > { %s491_s15 = smov 384   ;;  %s492_s18 = smov 24  }
  0x26   : > { %346 = dma.hbm_to_vmem [thread:$0]  (!%p557_p9), %s555_s23, 1536, %s561_s26, %s563_s27, %s491_s15, %s491_s15, %s492_s18  }
  0x27   : > { %p334_p11 = scmp.ge.s32.totalorder %s488_s11, 1  ;;  %p119_p13 = scmp.lt.s32.totalorder %s488_s11, 3 }
  0x29   : > { %p120_p3 = pnand %p334_p11, %p119_p13 }
  0x2a   : > { %s125_s19 = sand.u32 (!%p120_p3), 1, %s472_s7  }
  0x2b   : > { %123 = sbr.rel (%p120_p3) target bundleno = 318 (0x13e), region = 24  ;;  %s126_s21 = scalar_lea.sflag (!%p120_p3), [#allocation3], %s125_s19 }
  0x2c   : > { %s340_s20 = smul.u32 (!%p120_p3), 96, %s125_s19 }
  0x2e   : > { %s129_s22 = scalar_lea.vmem (!%p120_p3), [#allocation2], %s340_s20 }
  0x32   : > { %463 = dma.done.wait (%p542_p7), %s126_s21, 1536  }
  0x33   : > { %465 = vsyncadd (%p542_p7), %s126_s21, 4294965760  ;;  %v152_v0 = vld [vmem:[%s129_s22] sm:$0xff]  ;;  %v153_v1 = vld [vmem:[%s129_s22 + $0x8] sm:$0xff]  ;;  %p148_p7 = scmp.lt.s32.totalorder %s480_s9, 1  ;;  %vm199_vm3 = vcmask 7168  }
  0x34   : > { %v154_v2 = vld [vmem:[%s129_s22 + $0x10] sm:$0xff]  ;;  %v155_v3 = vld [vmem:[%s129_s22 + $0x18] sm:$0xff]  ;;  %v156_v4 = vld [vmem:[%s129_s22 + $0x20] sm:$0xff] }
  0x35   : > { %v157_v5 = vld [vmem:[%s129_s22 + $0x28] sm:$0xff]  ;;  %v158_v6 = vld [vmem:[%s129_s22 + $0x30] sm:$0xff]  ;;  %v159_v7 = vld [vmem:[%s129_s22 + $0x38] sm:$0xff]  ;;  %v164_v9 = vadd.f32 %v155_v3, %v152_v0  ;;  %v167_v10 = vadd.f32 %v156_v4, %v153_v1  ;;  %s644_s9 = smov (!%p148_p7, %s480_s9), 1 }
  0x36   : > { %v160_v8 = vld [vmem:[%s129_s22 + $0x40] sm:$0xff]  ;;  %v170_v11 = vadd.f32 %v157_v5, %v154_v2  ;;  %v161_v12 = vld [vmem:[%s129_s22 + $0x48] sm:$0xff]  ;;  %v162_v13 = vld [vmem:[%s129_s22 + $0x50] sm:$0xff]  ;;  %s335_s16 = sshll.u32 %s644_s9, 3 }
  0x37   : > { %v163_v14 = vld [vmem:[%s129_s22 + $0x58] sm:$0xff]  ;;  %v165_v15 = vadd.f32 %v164_v9, %v158_v6  ;;  %v168_v16 = vadd.f32 %v167_v10, %v159_v7  ;;  %s603_s25 = scalar_lea.vmem %s633_s1, %s335_s16 }
  0x38   : > { %v171_v17 = vadd.f32 %v170_v11, %v160_v8 }
  0x39   : > { %v166_v18 = vadd.f32 %v165_v15, %v161_v12  ;;  %v169_v19 = vadd.f32 %v168_v16, %v162_v13 }
  0x3a   : > { %v172_v20 = vadd.f32 %v171_v17, %v163_v14 }
  0x3b   : > { %v173_v21 = vmul.f32 0.25, %v166_v18  ;;  %v174_v22 = vmul.f32 0.25, %v169_v19 }
  0x3c   : > { %v175_v23 = vmul.f32 0.25, %v172_v20 }
  0x3d   : > { %398 = vlog2.f32 %v173_v21  ;;  %vm176_vm0 = vcmp.gt.f32.partialorder %v173_v21, 0.0  ;;  %vm177_vm1 = vcmp.gt.f32.partialorder %v174_v22, 0.0 }
  0x3e   : > { %400 = vlog2.f32 %v174_v22  ;;  %vm178_vm2 = vcmp.gt.f32.partialorder %v175_v23, 0.0 }
  0x3f   : > { %402 = vlog2.f32 %v175_v23 }
  0x47   : > { %v399_v24 = vpop.eup %398 }
  0x48   : > { %v401_v25 = vpop.eup %400  ;;  %v180_v26 = vmul.f32 0.6931472, %v399_v24 }
  0x49   : > { %v403_v27 = vpop.eup %402  ;;  %v182_v28 = vmul.f32 0.6931472, %v401_v25 }
  0x4a   : > { %v184_v29 = vmul.f32 0.6931472, %v403_v27  ;;  %v185_v30 = vmul.f32 %v180_v26, %v173_v21 }
  0x4b   : > { %v186_v31 = vmul.f32 %v182_v28, %v174_v22 }
  0x4c   : > { %v187_v32 = vmul.f32 %v184_v29, %v175_v23  ;;  %v188_v33 = vsel %vm176_vm0, %v185_v30, 0.0 }
  0x4d   : > { %v189_v34 = vsel %vm177_vm1, %v186_v31, 0.0 }
  0x4e   : > { %v190_v35 = vsel %vm178_vm2, %v187_v32, 0.0  ;;  %v191_v36 = vadd.f32 %v189_v34, %v188_v33 }
  0x50   : > { %v192_v37 = vadd.f32 %v191_v36, %v190_v35 }
  0x52   : > { %193 = vadd.xlane.f32.xlu0 %v192_v37 }
  0xdf   : > { %v194_v38 = vpop.xlane.xlu0 %193 }
  0xe0   : > { %200 = vst.msk [vmem:[%s603_s25] sm:$0xff] %vm199_vm3, %v194_v38 }
  0xe7   : > { %v212_v39 = vld [vmem:[%s603_s25] sm:$0xff] }
  0xe8   : > { %v214_v40 = vsel %vm199_vm3, %v212_v39, inf }
  0xe9   : > { %v215_v41 = vrot.slane %v214_v40, 4 }
  0xeb   : > { %v216_v42 = vmin.f32 %v214_v40, %v215_v41 }
  0xed   : > { %v217_v43 = vrot.slane %v216_v42, 2 }
  0xef   : > { %v218_v44 = vmin.f32 %v216_v42, %v217_v43 }
  0xf1   : > { %v219_v45 = vrot.slane %v218_v44, 1 }
  0xf3   : > { %v220_v46 = vmin.f32 %v218_v44, %v219_v45 }
  0xf5   : > { %v221_v47 = vsub.f32 %v212_v39, %v220_v46 }
  0xf7   : > { %v222_v48 = vsel %vm199_vm3, %v221_v47, -inf }
  0xf8   : > { %v223_v49 = vrot.slane %v222_v48, 4 }
  0xfa   : > { %v224_v50 = vmax.f32 %v222_v48, %v223_v49 }
  0xfc   : > { %v225_v51 = vrot.slane %v224_v50, 2 }
  0xfe   : > { %v226_v52 = vmax.f32 %v224_v50, %v225_v51 }
 0x100   : > { %v227_v53 = vrot.slane %v226_v52, 1 }
 0x102   : > { %v228_v54 = vmax.f32 %v226_v52, %v227_v53 }
 0x104   : > { %404 = vrcp.f32 %v228_v54 }
 0x10e   : > { %v405_v55 = vpop.eup %404 }
 0x10f   : > { %v230_v56 = vmul.f32 %v405_v55, %v221_v47 }
 0x111   : > { %v231_v57 = vsel %vm199_vm3, %v230_v56, 0.0 }
 0x112   : > { %v232_v58 = vrot.slane %v231_v57, 4 }
 0x114   : > { %v233_v59 = vadd.f32 %v232_v58, %v231_v57 }
 0x116   : > { %v234_v60 = vrot.slane %v233_v59, 2 }
 0x118   : > { %v235_v61 = vadd.f32 %v234_v60, %v233_v59 }
 0x11a   : > { %v236_v62 = vrot.slane %v235_v61, 1 }
 0x11c   : > { %v237_v63 = vadd.f32 %v236_v62, %v235_v61 }
 0x11e   : > { %v239_v0 = vmul.f32 0.125, %v237_v63 }
 0x120   : > { %v241_v1 = vsub.f32 %v230_v56, %v239_v0  ;;  %vm240_vm4 = vcmp.lt.f32.partialorder %v230_v56, %v239_v0 }
 0x122   : > { %v242_v2 = vsel %vm199_vm3, %v241_v1, -inf }
 0x123   : > { %v243_v3 = vrot.slane %v242_v2, 4 }
 0x125   : > { %v244_v4 = vmax.f32 %v242_v2, %v243_v3 }
 0x127   : > { %v245_v5 = vrot.slane %v244_v4, 2 }
 0x129   : > { %v246_v6 = vmax.f32 %v244_v4, %v245_v5 }
 0x12b   : > { %v247_v7 = vrot.slane %v246_v6, 1 }
 0x12d   : > { %v248_v8 = vmax.f32 %v246_v6, %v247_v7 }
 0x12f   : > { %406 = vrcp.f32 %v248_v8 }
 0x139   : > { %v407_v9 = vpop.eup %406 }
 0x13a   : > { %v250_v10 = vmul.f32 %v407_v9, %v241_v1 }
 0x13c   : > { %v251_v11 = vsel %vm240_vm4, 0.0, %v250_v10 }
 0x13d   : > { %252 = vst.msk [vmem:[%s603_s25] sm:$0xff] %vm199_vm3, %v251_v11 }
 0x13e PF: > { %s14_s11 = sadd.s32 1, %s488_s11   ;;  %s636_s6 = smov %s472_s7 }
 0x13f   : > { %p11_p9 = scmp.ge.s32.totalorder %s14_s11, 4   ;;  %s637_s7 = smov %s476_s8 }
 0x140   : > { %s638_s8 = smov %s548_s17  ;;  %s639_s9 = smov %s484_s10 }
 0x141   : > { %s640_s10 = smov %s642_s13  ;;  %13 = sbr.rel (!%p11_p9) target bundleno = 4 (0x4), region = 76 }
 0x148   :  { %272 = vsyncpa [#allocation3], 1 }
 0x149   :  { %274 = vsyncpa [#allocation3 + $0x1], 1 }

</bundles_post_ra>
